<compile_context>
chip_gen: v7x
topology: tpu7x:2x2x1
jax: 0.10.0
libtpu: 0.0.40
codegen_flags: <defaults>
</compile_context>

<pallas_src>
import functools

import numpy as np
import jax
import jax.numpy as jnp
from jax.experimental import pallas as pl
from jax.experimental.pallas import tpu as pltpu

ZZ = np.array(
    [0, 1, 5, 6, 14, 15, 27, 28, 2, 4, 7, 13, 16, 26, 29, 42, 3, 8, 12, 17,
     25, 30, 41, 43, 9, 11, 18, 24, 31, 40, 44, 53, 10, 19, 23, 32, 39, 45,
     52, 54, 20, 22, 33, 38, 46, 51, 55, 60, 21, 34, 37, 47, 50, 56, 59, 61,
     35, 36, 48, 49, 57, 58, 62, 63], dtype=np.int32)
INV_ZZ = np.argsort(ZZ).astype(np.int32)


def zz_encode(x):
    # x: (N, S, C, 8, 8) -> (N, S, C, 64); encoded[..., ZZ[c]] = flat[..., c]
    flat = x.reshape(x.shape[:-2] + (64,))
    return flat[..., INV_ZZ]


def zz_decode(enc):
    # enc: (..., 64) -> (..., 8, 8); decoded[..., i, j] = enc[..., ZZ[i*8+j]]
    return enc[..., ZZ].reshape(enc.shape[:-1] + (8, 8))


def _round_up(a, m):
    return (a + m - 1) // m * m


def _bn_fold(gamma, beta, mean, var, eps=1e-5):
    scale = gamma / jnp.sqrt(var + eps)
    shift = beta - mean * scale
    return scale, shift


# ----------------------------------------------------------------------------
# Pallas kernel: one grid step processes Bt (batch, channel) slabs.
# ----------------------------------------------------------------------------
def _qtable_kernel(x_ref, wl_ref, bl_ref, w1b_ref, b1_ref, w2_ref, o_ref,
                   *, samples, b2f, s3, t3, max_q, bf16_act):
    S = samples
    rows, D = x_ref.shape                 # rows = Bt * S, D = 64
    Bt = rows // S
    S2 = w1b_ref.shape[1]
    act_dt = jnp.bfloat16 if bf16_act else jnp.float32

    # embedding_layer: Linear(64, 256) with zig-zag permutation and the
    # 0::4 column subsampling folded into wl  -> one big bf16 MXU matmul.
    x = x_ref[...]                                                   # bf16 (Bt*S, 64)
    h1 = jnp.dot(x, wl_ref[...], preferred_element_type=jnp.float32)
    h1 = jax.nn.sigmoid((h1 + bl_ref[...]).astype(act_dt))           # (Bt*S, 64)

    # sample_learning[0..2]: 1x1 Conv(S -> S/2) with BN2d(S) folded in, as a
    # batched matmul over the Bt slabs (contraction over the S sublanes).
    # w1b is the shared weight, pre-broadcast once in the wrapper and kept
    # VMEM-resident (constant block index), so no per-step broadcast stores.
    h1b = h1.reshape(Bt, S, D).astype(jnp.bfloat16)
    h2 = jnp.einsum("bps,bsd->bpd", w1b_ref[...], h1b,
                    preferred_element_type=jnp.float32)              # (Bt, S2, 64)
    h2 = jnp.tanh((h2 + b1_ref[...]).astype(act_dt))                 # b1f: (S2, 1)

    # sample_learning[3..5]: 1x1 Conv(S/2 -> 1) with BN2d(S/2) folded in.
    # M=1 matmul replaced by a VPU multiply + sublane reduction.
    h3 = jnp.sum(h2.astype(jnp.float32) * w2_ref[...], axis=1)       # (Bt, 64)

    z = jax.nn.sigmoid(h3 + b2f)          # conv2 bias (+ folded BN2 shift)
    z = z * s3 + t3                       # BatchNorm2d(1), eval mode (scalars)
    o_ref[...] = (jax.nn.sigmoid(z) * max_q).astype(o_ref.dtype)


def qtable_forward(x, weights, scalars, max_q, block_slabs=512, bf16_act=None):
    """x: (N, S, C, 8, 8) float -> (N, C, 8, 8) float32."""
    N, S, C, d0, d1 = x.shape
    assert d0 == 8 and d1 == 8
    B = N * C

    if bf16_act is None:
        # bf16 VPU/EUP paths exist on v6e/v7x; keep f32 activations on <= v5.
        kind = jax.devices()[0].device_kind.lower()
        bf16_act = not any(t in kind for t in ("v2", "v3", "v4", "v5"))

    # Slab-block size: multiple of 8; when B allows, >= 2 steps AND an even
    # step count so the "parallel" grid axis balances across v7x's 2 cores;
    # the cap (default 512 slabs) amortizes the ~0.35 us per-step overhead.
    cap = max(8, _round_up(block_slabs, 8))
    n_steps = max(1, -(-B // cap))
    if B > 8:
        n_steps = max(n_steps, 2)
        if n_steps % 2:
            n_steps += 1
    Bt = _round_up(-(-B // n_steps), 8)
    n_steps = -(-B // Bt)
    Bpad = n_steps * Bt

    # One fused HBM pass: (N,S,C,64) -> transpose -> bf16 cast -> pad.
    flat = x.reshape(N, S, C, 64)
    xe = jnp.transpose(flat, (0, 2, 1, 3)).astype(jnp.bfloat16)      # (N,C,S,64)
    xe = xe.reshape(B, S, 64)
    if Bpad != B:
        xe = jnp.pad(xe, ((0, Bpad - B), (0, 0), (0, 0)))
    x2d = xe.reshape(Bpad * S, 64)

    wl, bl, w1f, b1f, w2c = weights
    b2f, s3, t3 = scalars
    S2 = w1f.shape[0]

    # Shared conv1 weight pre-broadcast across the Bt slabs (bf16, ~Bt*S2*S*2
    # bytes); constant index_map -> DMA'd once, stays resident in VMEM.
    w1b = jnp.broadcast_to(w1f[None, :, :], (Bt, S2, S))

    kernel = functools.partial(
        _qtable_kernel, samples=S, bf16_act=bool(bf16_act),
        b2f=float(b2f), s3=float(s3), t3=float(t3), max_q=float(max_q))

    in_specs = [
        pl.BlockSpec((Bt * S, 64), lambda i: (i, 0)),
        pl.BlockSpec(wl.shape, lambda i: (0, 0)),
        pl.BlockSpec(bl.shape, lambda i: (0, 0)),
        pl.BlockSpec(w1b.shape, lambda i: (0, 0, 0)),
        pl.BlockSpec(b1f.shape, lambda i: (0, 0)),
        pl.BlockSpec(w2c.shape, lambda i: (0, 0)),
    ]

    out = pl.pallas_call(
        kernel,
        out_shape=jax.ShapeDtypeStruct((Bpad, 64), jnp.float32),
        grid_spec=pltpu.PrefetchScalarGridSpec(
            num_scalar_prefetch=0,
            grid=(n_steps,),
            in_specs=in_specs,
            out_specs=pl.BlockSpec((Bt, 64), lambda i: (i, 0)),
        ),
        compiler_params=pltpu.CompilerParams(
            dimension_semantics=("parallel",),
            # 32 MiB: raises v5e's 16 MiB default; already the default on
            # v6e/v7x.  At Bt=512 the bf16 working set is ~10-14 MiB.
            vmem_limit_bytes=32 * 1024 * 1024),
    )(x2d, wl, bl, w1b, b1f, w2c)

    y64 = out[:B].reshape(N, C, 64)      # sigmoid * max_q already applied
    return zz_decode(y64)                # (N, C, 8, 8); n_qtables == 1


# ----------------------------------------------------------------------------
# Parameter construction + folding
# ----------------------------------------------------------------------------
def init_raw_params(key, samples=32):
    """Deterministic synthetic parameters matching the module's shapes."""
    S = samples
    S2 = S // 2
    ks = jax.random.split(key, 16)
    return dict(
        W_lin=jax.random.normal(ks[0], (256, 64), jnp.float32) / np.sqrt(64.0),
        b_lin=0.1 * jax.random.normal(ks[1], (256,), jnp.float32),
        g1=1.0 + 0.1 * jax.random.normal(ks[2], (S,), jnp.float32),
        be1=0.1 * jax.random.normal(ks[3], (S,), jnp.float32),
        m1=0.1 * jax.random.normal(ks[4], (S,), jnp.float32),
        v1=jax.random.uniform(ks[5], (S,), jnp.float32, 0.5, 1.5),
        W1=jax.random.normal(ks[6], (S2, S), jnp.float32) / np.sqrt(S),
        b1=0.1 * jax.random.normal(ks[7], (S2,), jnp.float32),
        g2=1.0 + 0.1 * jax.random.normal(ks[8], (S2,), jnp.float32),
        be2=0.1 * jax.random.normal(ks[9], (S2,), jnp.float32),
        m2=0.1 * jax.random.normal(ks[10], (S2,), jnp.float32),
        v2=jax.random.uniform(ks[11], (S2,), jnp.float32, 0.5, 1.5),
        W2=jax.random.normal(ks[12], (S2,), jnp.float32) / np.sqrt(S2),
        b2=0.1 * jax.random.normal(ks[13], (), jnp.float32),
        g3=jnp.float32(1.05), be3=jnp.float32(0.02),
        m3=jnp.float32(0.01), v3=jnp.float32(1.10),
    )


def prepare_params(raw):
    """Fold zig-zag, stride subsampling and eval-mode BatchNorms into weights."""
    S2, S = raw["W1"].shape

    s1, t1 = _bn_fold(raw["g1"], raw["be1"], raw["m1"], raw["v1"])
    s2, t2 = _bn_fold(raw["g2"], raw["be2"], raw["m2"], raw["v2"])
    s3, t3 = _bn_fold(raw["g3"], raw["be3"], raw["m3"], raw["v3"])

    # Linear(64, 256): only output columns 0::4 survive the two stride-2
    # 1x1 convs; the zig-zag encode permutation folds into the weight rows.
    W_keep = raw["W_lin"][0::4, :]          # (64 out, 64 in)
    wl = W_keep.T                           # (64 in, 64 out)
    wl_zz = wl[ZZ, :]                       # rows permuted: raw raster input
    bl = raw["b_lin"][0::4].reshape(1, 64)

    # Conv2d(S, S//2, 1) with BatchNorm2d(S) folded into its input.
    w1f = raw["W1"] * s1[None, :]
    b1f = (raw["b1"] + raw["W1"] @ t1).reshape(S2, 1)

    # Conv2d(S//2, 1, 1) with BatchNorm2d(S//2) folded into its input.
    w2f = (raw["W2"] * s2).reshape(S2, 1)
    b2f = raw["b2"] + jnp.dot(raw["W2"], t2)

    weights = (wl_zz.astype(jnp.bfloat16),
               bl.astype(jnp.float32),
               w1f.astype(jnp.bfloat16),
               b1f.astype(jnp.float32),
               w2f.astype(jnp.float32))
    scalars = (float(b2f), float(s3), float(t3))   # baked as constants
    return weights, scalars


# ----------------------------------------------------------------------------
# Pure-JAX f32 reference (mirrors the PyTorch module, eval-mode BN)
# ----------------------------------------------------------------------------
def reference_forward(x, raw, max_q):
    enc = zz_encode(x)                                          # (N,S,C,64)
    h = enc @ raw["W_lin"].T + raw["b_lin"]                     # (N,S,C,256)
    h = jax.nn.sigmoid(h)
    s1, t1 = _bn_fold(raw["g1"], raw["be1"], raw["m1"], raw["v1"])
    h = h * s1[None, :, None, None] + t1[None, :, None, None]
    h = h[..., ::2]                                             # conv1 stride (1,2)
    h = jnp.einsum("ps,nscw->npcw", raw["W1"], h) + raw["b1"][None, :, None, None]
    h = jnp.tanh(h)
    s2, t2 = _bn_fold(raw["g2"], raw["be2"], raw["m2"], raw["v2"])
    h = h * s2[None, :, None, None] + t2[None, :, None, None]
    h = h[..., ::2]                                             # conv2 stride (1,2)
    h = jnp.einsum("p,npcw->ncw", raw["W2"], h) + raw["b2"]     # (N,C,64)
    h = jax.nn.sigmoid(h)
    s3, t3 = _bn_fold(raw["g3"], raw["be3"], raw["m3"], raw["v3"])
    h = h * s3 + t3
    dec = zz_decode(h)                                          # (N,C,8,8)
    return jax.nn.sigmoid(dec) * max_q


if __name__ == "__main__":
    key = jax.random.PRNGKey(0)
    kx, kx2, kp = jax.random.split(key, 3)

    # Config A: small, odd B -> exercises batching + padding; f32 activations
    # (matches the previously validated path), tolerance ~0.8% of 0..255.
    N, S, C = 5, 32, 3
    x = jax.random.normal(kx, (N, S, C, 8, 8), jnp.float32)
    raw = init_raw_params(kp, samples=S)
    weights, scalars = prepare_params(raw)

    y = qtable_forward(x, weights, scalars, max_q=255.0,
                       block_slabs=8, bf16_act=False)
    y = jax.block_until_ready(y)
    assert y.shape == (N, C, 8, 8), y.shape
    assert bool(jnp.all(jnp.isfinite(y)))
    assert bool(jnp.all((y >= 0.0) & (y <= 255.0)))
    ref = reference_forward(x, raw, max_q=255.0)
    max_err = float(jnp.max(jnp.abs(y - ref)))
    # bf16 matmuls vs f32 reference; ~0.8% of the 0..255 output range.
    assert max_err < 2.0, f"config A: max abs error vs f32 reference: {max_err}"

    # Config B: default block_slabs (Bt capped by the even-step rule), no
    # padding, bf16 activations auto-enabled on v6e/v7x.  Slightly looser
    # tolerance (~1.2% of 0..255) to cover bf16 sigmoid/tanh arguments.
    N2, C2 = 16, 4
    x2 = jax.random.normal(kx2, (N2, S, C2, 8, 8), jnp.float32)
    y2 = qtable_forward(x2, weights, scalars, max_q=255.0)
    y2 = jax.block_until_ready(y2)
    assert y2.shape == (N2, C2, 8, 8), y2.shape
    assert bool(jnp.all(jnp.isfinite(y2)))
    assert bool(jnp.all((y2 >= 0.0) & (y2 <= 255.0)))
    ref2 = reference_forward(x2, raw, max_q=255.0)
    max_err2 = float(jnp.max(jnp.abs(y2 - ref2)))
    assert max_err2 < 3.0, f"config B: max abs error vs f32 reference: {max_err2}"

    print("KERNEL_OK")
</pallas_src>

<mosaic_0001>
module attributes {stable_mosaic.version = 11 : i64} {
  func.func @_qtable_kernel(%arg0: i32, %arg1: memref<256x64xbf16, #tpu.memory_space<vmem>>, %arg2: memref<64x64xbf16, #tpu.memory_space<vmem>>, %arg3: memref<1x64xf32, #tpu.memory_space<vmem>>, %arg4: memref<8x16x32xbf16, #tpu.memory_space<vmem>>, %arg5: memref<16x1xf32, #tpu.memory_space<vmem>>, %arg6: memref<16x1xf32, #tpu.memory_space<vmem>>, %arg7: memref<8x64xf32, #tpu.memory_space<vmem>>) attributes {dimension_semantics = [#tpu.dimension_semantics<parallel>], iteration_bounds = array<i64: 2>, scalar_prefetch = 0 : i64, scratch_operands = 0 : i64, tpu.core_type = #tpu.core_type<tc>, window_params = [{transform_indices = @transform_0, window_bounds = array<i64: 256, 64>}, {pipeline_mode = #tpu.pipeline_mode<synchronous>, transform_indices = @transform_1, window_bounds = array<i64: 64, 64>}, {pipeline_mode = #tpu.pipeline_mode<synchronous>, transform_indices = @transform_2, window_bounds = array<i64: 1, 64>}, {pipeline_mode = #tpu.pipeline_mode<synchronous>, transform_indices = @transform_3, window_bounds = array<i64: 8, 16, 32>}, {pipeline_mode = #tpu.pipeline_mode<synchronous>, transform_indices = @transform_4, window_bounds = array<i64: 16, 1>}, {pipeline_mode = #tpu.pipeline_mode<synchronous>, transform_indices = @transform_5, window_bounds = array<i64: 16, 1>}, {transform_indices = @transform_6, window_bounds = array<i64: 8, 64>}]} {
    %c0 = arith.constant 0 : index
    %c0_0 = arith.constant 0 : index
    %0 = vector.load %arg1[%c0, %c0_0] : memref<256x64xbf16, #tpu.memory_space<vmem>>, vector<256x64xbf16>
    %c0_1 = arith.constant 0 : index
    %c0_2 = arith.constant 0 : index
    %1 = vector.load %arg2[%c0_1, %c0_2] : memref<64x64xbf16, #tpu.memory_space<vmem>>, vector<64x64xbf16>
    %cst = arith.constant dense<0.000000e+00> : vector<256x64xf32>
    %2 = tpu.matmul %0, %1, %cst {dimension_numbers = #tpu.dot_dimension_numbers<[1], [0], [0], [1], [0, 0, 1, 1], [], []>} : vector<256x64xbf16>, vector<64x64xbf16>, vector<256x64xf32> -> vector<256x64xf32>
    %c0_3 = arith.constant 0 : index
    %c0_4 = arith.constant 0 : index
    %3 = vector.load %arg3[%c0_3, %c0_4] : memref<1x64xf32, #tpu.memory_space<vmem>>, vector<1x64xf32>
    %4 = vector.broadcast %3 : vector<1x64xf32> to vector<256x64xf32>
    %5 = arith.addf %2, %4 : vector<256x64xf32>
    %6 = arith.negf %5 : vector<256x64xf32>
    %7 = math.exp %6 : vector<256x64xf32>
    %cst_5 = arith.constant 1.000000e+00 : f32
    %8 = vector.broadcast %cst_5 : f32 to vector<256x64xf32>
    %9 = arith.addf %8, %7 : vector<256x64xf32>
    %10 = arith.divf %8, %9 : vector<256x64xf32>
    %11 = vector.shape_cast %10 : vector<256x64xf32> to vector<8x32x64xf32>
    %12 = arith.truncf %11 : vector<8x32x64xf32> to vector<8x32x64xbf16>
    %c0_6 = arith.constant 0 : index
    %c0_7 = arith.constant 0 : index
    %c0_8 = arith.constant 0 : index
    %13 = vector.load %arg4[%c0_6, %c0_7, %c0_8] : memref<8x16x32xbf16, #tpu.memory_space<vmem>>, vector<8x16x32xbf16>
    "tpu.trace_start"() <{level = 10 : i32, message = "bps,bsd->bpd"}> : () -> ()
    %cst_9 = arith.constant dense<0.000000e+00> : vector<8x16x64xf32>
    %14 = tpu.matmul %13, %12, %cst_9 {dimension_numbers = #tpu.dot_dimension_numbers<[2], [1], [1], [2], [0, 0, 0, 1, 1, 2], [0], [0]>} : vector<8x16x32xbf16>, vector<8x32x64xbf16>, vector<8x16x64xf32> -> vector<8x16x64xf32>
    "tpu.trace_stop"() : () -> ()
    %c0_10 = arith.constant 0 : index
    %c0_11 = arith.constant 0 : index
    %15 = vector.load %arg5[%c0_10, %c0_11] : memref<16x1xf32, #tpu.memory_space<vmem>>, vector<16x1xf32>
    %16 = vector.shape_cast %15 : vector<16x1xf32> to vector<1x16x1xf32>
    %17 = vector.broadcast %16 : vector<1x16x1xf32> to vector<8x16x64xf32>
    %18 = arith.addf %14, %17 : vector<8x16x64xf32>
    %19 = math.tanh %18 : vector<8x16x64xf32>
    %c0_12 = arith.constant 0 : index
    %c0_13 = arith.constant 0 : index
    %20 = vector.load %arg6[%c0_12, %c0_13] : memref<16x1xf32, #tpu.memory_space<vmem>>, vector<16x1xf32>
    %21 = vector.shape_cast %20 : vector<16x1xf32> to vector<1x16x1xf32>
    %22 = vector.broadcast %21 : vector<1x16x1xf32> to vector<8x16x64xf32>
    %23 = arith.mulf %19, %22 : vector<8x16x64xf32>
    %cst_14 = arith.constant dense<0.000000e+00> : vector<8x64xf32>
    %24 = vector.multi_reduction <add>, %23, %cst_14 [1] : vector<8x16x64xf32> to vector<8x64xf32>
    %cst_15 = arith.constant -0.320417762 : f32
    %25 = vector.broadcast %cst_15 : f32 to vector<8x64xf32>
    %26 = arith.addf %24, %25 : vector<8x64xf32>
    %27 = arith.negf %26 : vector<8x64xf32>
    %28 = math.exp %27 : vector<8x64xf32>
    %cst_16 = arith.constant 1.000000e+00 : f32
    %29 = vector.broadcast %cst_16 : f32 to vector<8x64xf32>
    %30 = arith.addf %29, %28 : vector<8x64xf32>
    %31 = arith.divf %29, %30 : vector<8x64xf32>
    %cst_17 = arith.constant 1.00113118 : f32
    %32 = vector.broadcast %cst_17 : f32 to vector<8x64xf32>
    %33 = arith.mulf %31, %32 : vector<8x64xf32>
    %cst_18 = arith.constant 0.00998868793 : f32
    %34 = vector.broadcast %cst_18 : f32 to vector<8x64xf32>
    %35 = arith.addf %33, %34 : vector<8x64xf32>
    %36 = arith.negf %35 : vector<8x64xf32>
    %37 = math.exp %36 : vector<8x64xf32>
    %cst_19 = arith.constant 1.000000e+00 : f32
    %38 = vector.broadcast %cst_19 : f32 to vector<8x64xf32>
    %39 = arith.addf %38, %37 : vector<8x64xf32>
    %40 = arith.divf %38, %39 : vector<8x64xf32>
    %cst_20 = arith.constant 2.550000e+02 : f32
    %41 = vector.broadcast %cst_20 : f32 to vector<8x64xf32>
    %42 = arith.mulf %40, %41 : vector<8x64xf32>
    %c0_21 = arith.constant 0 : index
    %c0_22 = arith.constant 0 : index
    %43 = vector.load %arg7[%c0_21, %c0_22] : memref<8x64xf32, #tpu.memory_space<vmem>>, vector<8x64xf32>
    tpu.vector_store %arg7[%c0_21, %c0_22], %42 {strides = array<i32>} : memref<8x64xf32, #tpu.memory_space<vmem>>, vector<8x64xf32>,
    return
  }
  func.func @transform_0(%arg0: i32) -> (i32, i32) {
    %c0_i32 = arith.constant 0 : i32
    %c0_i32_0 = arith.constant 0 : i32
    return %arg0, %c0_i32 : i32, i32
  }
  func.func @transform_1(%arg0: i32) -> (i32, i32) {
    %c0_i32 = arith.constant 0 : i32
    %c0_i32_0 = arith.constant 0 : i32
    %c0_i32_1 = arith.constant 0 : i32
    return %c0_i32, %c0_i32_0 : i32, i32
  }
  func.func @transform_2(%arg0: i32) -> (i32, i32) {
    %c0_i32 = arith.constant 0 : i32
    %c0_i32_0 = arith.constant 0 : i32
    %c0_i32_1 = arith.constant 0 : i32
    return %c0_i32, %c0_i32_0 : i32, i32
  }
  func.func @transform_3(%arg0: i32) -> (i32, i32, i32) {
    %c0_i32 = arith.constant 0 : i32
    %c0_i32_0 = arith.constant 0 : i32
    %c0_i32_1 = arith.constant 0 : i32
    %c0_i32_2 = arith.constant 0 : i32
    return %c0_i32, %c0_i32_0, %c0_i32_1 : i32, i32, i32
  }
  func.func @transform_4(%arg0: i32) -> (i32, i32) {
    %c0_i32 = arith.constant 0 : i32
    %c0_i32_0 = arith.constant 0 : i32
    %c0_i32_1 = arith.constant 0 : i32
    return %c0_i32, %c0_i32_0 : i32, i32
  }
  func.func @transform_5(%arg0: i32) -> (i32, i32) {
    %c0_i32 = arith.constant 0 : i32
    %c0_i32_0 = arith.constant 0 : i32
    %c0_i32_1 = arith.constant 0 : i32
    return %c0_i32, %c0_i32_0 : i32, i32
  }
  func.func @transform_6(%arg0: i32) -> (i32, i32) {
    %c0_i32 = arith.constant 0 : i32
    %c0_i32_0 = arith.constant 0 : i32
    return %arg0, %c0_i32 : i32, i32
  }
}

</mosaic_0001>

<bundles_post_ra>
// kernel: tpu_custom_call.1
= control target key start
LH: loop header
LB: loop body
LE: loop exit
PB: predicated region body
PF: predicated region fallthrough
CT: control target
= control target key end

     0   :  { %11 = vsyncpa [#allocation3], 0  ;;  %s2558_s0 = inlined_call_operand.vmem [shape: bf16[512,64], index: 0, kind: input, shape index: {}]   ;;  %s2559_s1 = inlined_call_operand.vmem [shape: bf16[64,64], index: 1, kind: input, shape index: {}]   ;;  %s2560_s2 = inlined_call_operand.vmem [shape: f32[1,64], index: 2, kind: input, shape index: {}]   ;;  %s2561_s3 = inlined_call_operand.vmem [shape: bf16[8,16,32], index: 3, kind: input, shape index: {}]   ;;  %s2562_s4 = inlined_call_operand.vmem [shape: f32[16,1], index: 4, kind: input, shape index: {}]   ;;  %s2563_s5 = inlined_call_operand.vmem [shape: f32[16,1], index: 5, kind: input, shape index: {}]   ;;  %s2564_s6 = inlined_call_operand.hbm [shape: f32[16,64], index: 6, kind: output, shape index: {}]  }
   0x1   :  { %13 = vsyncpa [#allocation3 + $0x1], 0  ;;  %s2243_s21 = smov 0   ;;  %s2245_s22 = smov 0  }
   0x2   :  { %s2247_s23 = smov 0   ;;  %s2249_s24 = smov 0  }
   0x3 LB: > { %s2264_s25 = sadd.s32 4294967295, %s2202_s24   ;;  %s1584_s26 = sadd.s32 4294967294, %s2202_s24   ;;  %s2202_s24 = sphi %s2249_s24, %s2570_s24   ;;  %s2198_s23 = sphi %s2247_s23, %s2569_s23   ;;  %s2194_s22 = sphi %s2245_s22, %s2568_s22   ;;  %s2190_s21 = sphi %s2243_s21, %s2567_s21  }
   0x4   : > { %s2268_s27 = sadd.s32 1, %s2202_s24   ;;  %s157_s28 = sadd.s32 1, %s2198_s23 }
   0x5   : > { %s154_s29 = ssub.s32 %s2202_s24, %s2268_s27  ;;  %p167_p0 = scmp.ne.s32.totalorder %s2198_s23, %s2194_s22 }
   0x6   : > { %p155_p1 = scmp.eq.s32.totalorder %s154_s29, 0  ;;  %p168_p2 = scmp.eq.s32.totalorder %s2264_s25, 1 }
   0x7   : > { %p173_p3 = scmp.ne.s32.totalorder %s2194_s22, %s2190_s21  ;;  %p174_p4 = scmp.eq.s32.totalorder %s1584_s26, 1 }
   0x8   : > { %s2279_s30 = scalar_select %p155_p1, %s2198_s23, %s157_s28  }
   0x9   : > { %p2281_p5 = por %p168_p2, %p167_p0  ;;  %p2285_p6 = por %p174_p4, %p173_p3 }
   0xa   : > { %p1587_p7 = scmp.ge.s32.totalorder %s2202_s24, 1  ;;  %p216_p8 = scmp.lt.s32.totalorder %s2202_s24, 3 }
   0xc   : > { %p217_p9 = pnand %p1587_p7, %p216_p8 }
   0xd   : > { %v1888_v0 = vld [vmem:[%s2559_s1] sm:$0xff] (!%p217_p9)   ;;  %s1589_s11 = sshll.u32 (!%p217_p9), %s2264_s25, 5  ;;  %v1889_v1 = vld [vmem:[%s2559_s1 + $0x8] sm:$0xff] (!%p217_p9)   ;;  %v1890_v2 = vld [vmem:[%s2559_s1 + $0x10] sm:$0xff] (!%p217_p9)   ;;  %vm404_vm0 = vcmask (!%p217_p9), 523264   ;;  %v2204_v20 = vmov (!%p217_p9), 0.0  }
   0xe   : > { %220 = sbr.rel (%p217_p9) target bundleno = 660 (0x294), region = 44  ;;  %p247_p10 = scmp.lt.s32.totalorder (!%p217_p9), %s1589_s11, 63  ;;  %1740 = vmatprep.subr.bf16.mxu0 (!%p217_p9), %v1888_v0  ;;  %v1891_v4 = vld [vmem:[%s2559_s1 + $0x18] sm:$0xff] (!%p217_p9)   ;;  %1780 = vmatprep.subr.bf16.mxu1 (!%p217_p9), %v2204_v20  ;;  %vm2205_vm1 = vmmov (!%p217_p9), 0   ;;  %v838_v21 = vld [vmem:[%s2562_s4] sm:$0xff] (!%p217_p9)  ;;  %v2206_v23 = vmov (!%p217_p9), 0  }
   0xf   : > { %1741 = vmatpush3.bf16.msra.mxu0 (!%p217_p9), %v1888_v0  ;;  %1784 = vmatprep.mubr.msk.bf16.mxu1 (!%p217_p9), %vm2205_vm1, %v2204_v20  ;;  %v1259_v22 = vld [vmem:[%s2563_s5] sm:$0xff] (!%p217_p9)  ;;  %v839_v24 = vld [vmem:[%s2562_s4 + $0x8] sm:$0xff] (!%p217_p9)  ;;  %vm855_vm2 = vcmask (!%p217_p9), 261120   ;;  %vm1495_vm3 = vcmask (!%p217_p9), 1041409   ;;  %vm1497_vm4 = vcmask (!%p217_p9), 1042434   ;;  %vm1499_vm5 = vcmask (!%p217_p9), 1043459  }
  0x10   : > { %1742 = vmatprep.subr.bf16.mxu0 (!%p217_p9), %v1889_v1  ;;  %1886 = vset.pattern.permute.xlu0 (!%p217_p9), %v2206_v23  ;;  %v1260_v25 = vld [vmem:[%s2563_s5 + $0x8] sm:$0xff] (!%p217_p9)  ;;  %v2359_v26 = vld [vmem:[%s2560_s2] ss:$0 sm:$0xff] (!%p217_p9)  ;;  %vm1501_vm6 = vcmask (!%p217_p9), 1044484   ;;  %vm1503_vm7 = vcmask (!%p217_p9), 1045509   ;;  %s243_s18 = sand.u32 (!%p217_p9), 1, %s2194_s22  }
  0x11   : > { %1887 = vset.pattern.permute.xlu1 (!%p217_p9), %v2206_v23  ;;  %842 = vperm.xlu0 (!%p217_p9), %1886, %v838_v21   ;;  %vm1505_vm8 = vcmask (!%p217_p9), 1046534   ;;  %s1693_s20 = sshll.u32 (!%p217_p9), %s2264_s25, 7  ;;  %vm1507_vm9 = vcmask (!%p217_p9), 1047559   ;;  %s2207_s12 = smov (!%p217_p9), [#allocation2]  }
  0x12   : > { %1263 = vperm.xlu1 (!%p217_p9), %1887, %v1259_v22   ;;  %s2515_s10 = scalar_lea.hbm (!%p217_p9), %s2564_s6, %s1693_s20  ;;  %s2144_s13 = sshll.u32 (!%p217_p9), %s2207_s12, 4  ;;  %s2145_s13 = int_to_ptr.vmem [resolvable:$false] %s2144_s13 }
  0x13   : > { %1743 = vmatpush3.bf16.msra.mxu0 (!%p217_p9), %v1889_v1  ;;  %s2146_s14 = scalar_lea.vmem (!%p217_p9), %s2145_s13, 256 }
  0x14   : > { %1744 = vmatprep.subr.bf16.mxu0 (!%p217_p9), %v1890_v2 }
  0x15   : > { %s2572_s11 = smov (!%p247_p10, %s1589_s11), 63  ;;  %847 = vperm.xlu0 %1886, %v839_v24  }
  0x16   : > { %s1590_s16 = sshll.u32 %s2572_s11, 2  ;;  %1268 = vperm.xlu1 %1887, %v1260_v25   ;;  %s1512_s11 = scalar_lea.sflag [#allocation3], %s243_s18 }
  0x17   : > { %s2304_s19 = scalar_lea.vmem %s2558_s0, %s1590_s16  ;;  %1745 = vmatpush3.bf16.msra.mxu0 %v1890_v2 }
  0x18   : > { %v1892_v3 = vld [vmem:[%s2304_s19] sm:$0xff]   ;;  %1746 = vmatprep.subr.bf16.mxu0 %v1891_v4  ;;  %v1893_v5 = vld [vmem:[%s2304_s19 + $0x8] sm:$0xff]   ;;  %v1894_v6 = vld [vmem:[%s2304_s19 + $0x10] sm:$0xff]  }
  0x19   : > { %1748 = vmatprep.mubr.msk.bf16.mxu0 %vm404_vm0, %v1892_v3  ;;  %v1895_v7 = vld [vmem:[%s2304_s19 + $0x18] sm:$0xff]   ;;  %v1896_v8 = vld [vmem:[%s2304_s19 + $0x20] sm:$0xff]   ;;  %v1897_v9 = vld [vmem:[%s2304_s19 + $0x28] sm:$0xff]  }
  0x1a   : > { %v1898_v10 = vld [vmem:[%s2304_s19 + $0x30] sm:$0xff]   ;;  %v1899_v11 = vld [vmem:[%s2304_s19 + $0x38] sm:$0xff]   ;;  %v1900_v12 = vld [vmem:[%s2304_s19 + $0x40] sm:$0xff]  }
  0x1b   : > { %1747 = vmatpush3.bf16.msra.mxu0 %v1891_v4  ;;  %v1901_v13 = vld [vmem:[%s2304_s19 + $0x48] sm:$0xff]   ;;  %v1902_v14 = vld [vmem:[%s2304_s19 + $0x50] sm:$0xff]   ;;  %v1903_v15 = vld [vmem:[%s2304_s19 + $0x58] sm:$0xff]  }
  0x1c   : > { %v1904_v16 = vld [vmem:[%s2304_s19 + $0x60] sm:$0xff]   ;;  %v1905_v17 = vld [vmem:[%s2304_s19 + $0x68] sm:$0xff]   ;;  %v1906_v18 = vld [vmem:[%s2304_s19 + $0x70] sm:$0xff]  }
  0x1d   : > { %v1907_v19 = vld [vmem:[%s2304_s19 + $0x78] sm:$0xff]   ;;  %s1588_s19 = sshll.u32 %s243_s18, 3 }
  0x1e   : > { %1749 = vmatmul.mubr.msk.bf16.vlgmr.msra.gmra.mrb[0].mxu0 %vm404_vm0, %v1893_v5  ;;  %s245_s26 = scalar_lea.vmem [#allocation2], %s1588_s19 }
  0x1f   : > { %1752 = vmatprep.mubr.msk.bf16.mxu0 %vm404_vm0, %v1894_v6  ;;  %s1525_s28 = sshll.u32 %s245_s26, 4  ;;  %s2517_s28 = int_to_ptr.vmem [resolvable:$true] %s1525_s28 }
  0x20   : > { %s2140_s25 = scalar_lea.vmem %s2517_s28, 128  ;;  %p2147_p0 = scmp.lt.s32.totalorder %s2517_s28, %s2145_s13 }
  0x21   : > { %p2141_p11 = scmp.ne.s32.totalorder %s2517_s28, %s2140_s25  ;;  %p2148_p1 = scmp.lt.s32.totalorder %s2146_s14, %s2140_s25 }
  0x23   : > { %p2142_p12 = pnand %p2141_p11, %p2281_p5  ;;  %p2149_p2 = por %p2148_p1, %p2147_p0 }
  0x25   : > { %p2143_p13 = pneg %p2142_p12 }
  0x26   : > { %1753 = vmatmul.mubr.msk.bf16.gmra.mrb[4].mxu0 %vm404_vm0, %v1895_v7 }
  0x27   : > { %1756 = vmatprep.mubr.msk.bf16.mxu0 %vm404_vm0, %v1896_v8  ;;  %p2150_p3 = pnand %p2149_p2, %p2143_p13 }
  0x2e   : > { %1757 = vmatmul.mubr.msk.bf16.gmra.mrb[8].mxu0 %vm404_vm0, %v1897_v9 }
  0x2f   : > { %1760 = vmatprep.mubr.msk.bf16.mxu0 %vm404_vm0, %v1898_v10 }
  0x36   : > { %1761 = vmatmul.mubr.msk.bf16.gmra.mrb[12].mxu0 %vm404_vm0, %v1899_v11 }
  0x37   : > { %1764 = vmatprep.mubr.msk.bf16.mxu0 %vm404_vm0, %v1900_v12 }
  0x3e   : > { %1765 = vmatmul.mubr.msk.bf16.gmra.mrb[16].mxu0 %vm404_vm0, %v1901_v13 }
  0x3f   : > { %1768 = vmatprep.mubr.msk.bf16.mxu0 %vm404_vm0, %v1902_v14 }
  0x46   : > { %1769 = vmatmul.mubr.msk.bf16.gmra.mrb[20].mxu0 %vm404_vm0, %v1903_v15 }
  0x47   : > { %1772 = vmatprep.mubr.msk.bf16.mxu0 %vm404_vm0, %v1904_v16 }
  0x4e   : > { %1773 = vmatmul.mubr.msk.bf16.gmra.mrb[24].mxu0 %vm404_vm0, %v1905_v17 }
  0x4f   : > { %1776 = vmatprep.mubr.msk.bf16.mxu0 %vm404_vm0, %v1906_v18 }
  0x56   : > { %1777 = vmatmul.mubr.msk.bf16.gmra.mrb[28].mxu0 %vm404_vm0, %v1907_v19 }
  0xf1   : > { %v1750_v27 = vpop.f32.mrb[0].mxu0 }
  0xf2   : > { %v496_v28 = vadd.f32 %v1750_v27, %v2359_v26  ;;  %v487_v29 = vpop.f32.mrb[1].mxu0 }
  0xf3   : > { %v488_v30 = vadd.f32 %v2359_v26, %v487_v29  ;;  %v1751_v31 = vpop.f32.mrb[2].mxu0 }
  0xf4   : > { %v1630_v32 = vmul.f32 -1.442695, %v496_v28  ;;  %v499_v33 = vadd.f32 %v1751_v31, %v2359_v26  ;;  %v490_v34 = vpop.f32.mrb[3].mxu0 }
  0xf5   : > { %v1628_v35 = vmul.f32 -1.442695, %v488_v30  ;;  %v491_v36 = vadd.f32 %v2359_v26, %v490_v34 }
  0xf6   : > { %1916 = vpow2.f32 %v1630_v32  ;;  %v1631_v37 = vmul.f32 -1.442695, %v499_v33 }
  0xf7   : > { %1918 = vpow2.f32 %v1628_v35  ;;  %v1629_v38 = vmul.f32 -1.442695, %v491_v36 }
  0xf8   : > { %1920 = vpow2.f32 %v1631_v37 }
  0xf9   : > { %1922 = vpow2.f32 %v1629_v38  ;;  %v1754_v39 = vpop.f32.mrb[4].mxu0 }
  0xfa   : > { %v512_v40 = vadd.f32 %v1754_v39, %v2359_v26  ;;  %v503_v41 = vpop.f32.mrb[5].mxu0 }
  0xfb   : > { %v504_v42 = vadd.f32 %v2359_v26, %v503_v41  ;;  %v1755_v43 = vpop.f32.mrb[6].mxu0 }
  0xfc   : > { %v1634_v44 = vmul.f32 -1.442695, %v512_v40  ;;  %v515_v45 = vadd.f32 %v1755_v43, %v2359_v26  ;;  %v506_v46 = vpop.f32.mrb[7].mxu0 }
  0xfd   : > { %v1632_v47 = vmul.f32 -1.442695, %v504_v42  ;;  %v507_v48 = vadd.f32 %v2359_v26, %v506_v46 }
  0xfe   : > { %1924 = vpow2.f32 %v1634_v44  ;;  %v1635_v49 = vmul.f32 -1.442695, %v515_v45 }
  0xff   : > { %1926 = vpow2.f32 %v1632_v47  ;;  %v1633_v50 = vmul.f32 -1.442695, %v507_v48 }
 0x100   : > { %v1917_v51 = vpop.eup %1916  ;;  %1928 = vpow2.f32 %v1635_v49 }
 0x101   : > { %v1919_v52 = vpop.eup %1918  ;;  %v712_v53 = vadd.f32 1.0, %v1917_v51  ;;  %1930 = vpow2.f32 %v1633_v50  ;;  %v1758_v54 = vpop.f32.mrb[8].mxu0 }
 0x102   : > { %v1921_v55 = vpop.eup %1920  ;;  %v710_v56 = vadd.f32 1.0, %v1919_v52  ;;  %v528_v57 = vadd.f32 %v1758_v54, %v2359_v26  ;;  %v519_v58 = vpop.f32.mrb[9].mxu0 }
 0x103   : > { %v1923_v59 = vpop.eup %1922  ;;  %1932 = vrcp.f32 %v712_v53  ;;  %v713_v60 = vadd.f32 1.0, %v1921_v55  ;;  %v520_v61 = vadd.f32 %v2359_v26, %v519_v58  ;;  %v1759_v62 = vpop.f32.mrb[10].mxu0 }
 0x104   : > { %1934 = vrcp.f32 %v710_v56  ;;  %v711_v63 = vadd.f32 1.0, %v1923_v59  ;;  %v1638_v0 = vmul.f32 -1.442695, %v528_v57  ;;  %v531_v1 = vadd.f32 %v1759_v62, %v2359_v26  ;;  %v522_v2 = vpop.f32.mrb[11].mxu0  ;;  %v1908_v56 = vld [vmem:[%s2561_s3] sm:$0xff]  }
 0x105   : > { %1936 = vrcp.f32 %v713_v60  ;;  %v1636_v3 = vmul.f32 -1.442695, %v520_v61  ;;  %v523_v4 = vadd.f32 %v2359_v26, %v522_v2 }
 0x106   : > { %1938 = vrcp.f32 %v711_v63  ;;  %v1639_v5 = vmul.f32 -1.442695, %v531_v1 }
 0x107   : > { %1940 = vpow2.f32 %v1638_v0  ;;  %v1637_v6 = vmul.f32 -1.442695, %v523_v4 }
 0x108   : > { %v1925_v7 = vpop.eup %1924  ;;  %1942 = vpow2.f32 %v1636_v3 }
 0x109   : > { %v1927_v8 = vpop.eup %1926  ;;  %v716_v9 = vadd.f32 1.0, %v1925_v7  ;;  %1944 = vpow2.f32 %v1639_v5  ;;  %v1762_v10 = vpop.f32.mrb[12].mxu0 }
 0x10a   : > { %v1929_v11 = vpop.eup %1928  ;;  %v714_v12 = vadd.f32 1.0, %v1927_v8  ;;  %1946 = vpow2.f32 %v1637_v6  ;;  %v544_v13 = vadd.f32 %v1762_v10, %v2359_v26  ;;  %v535_v14 = vpop.f32.mrb[13].mxu0 }
 0x10b   : > { %v1931_v15 = vpop.eup %1930  ;;  %1948 = vrcp.f32 %v716_v9  ;;  %v717_v16 = vadd.f32 1.0, %v1929_v11  ;;  %v536_v17 = vadd.f32 %v2359_v26, %v535_v14  ;;  %v1763_v18 = vpop.f32.mrb[14].mxu0 }
 0x10c   : > { %1950 = vrcp.f32 %v714_v12  ;;  %v715_v19 = vadd.f32 1.0, %v1931_v15  ;;  %v1642_v21 = vmul.f32 -1.442695, %v544_v13  ;;  %v547_v22 = vadd.f32 %v1763_v18, %v2359_v26  ;;  %v538_v23 = vpop.f32.mrb[15].mxu0  ;;  %v1909_v18 = vld [vmem:[%s2561_s3 + $0x8] sm:$0xff]  }
 0x10d   : > { %v1933_v24 = vpop.eup %1932  ;;  %1952 = vrcp.f32 %v717_v16  ;;  %v1640_v25 = vmul.f32 -1.442695, %v536_v17  ;;  %v539_v27 = vadd.f32 %v2359_v26, %v538_v23 }
 0x10e   : > { %v1935_v28 = vpop.eup %1934  ;;  %1954 = vrcp.f32 %v715_v19  ;;  %v1643_v29 = vmul.f32 -1.442695, %v547_v22 }
 0x10f   : > { %v1937_v30 = vpop.eup %1936  ;;  %1956 = vpow2.f32 %v1642_v21  ;;  %v1641_v31 = vmul.f32 -1.442695, %v539_v27 }
 0x110   : > { %v1939_v32 = vpop.eup %1938  ;;  %1958 = vpow2.f32 %v1640_v25  ;;  %v807_v33 = vpack.c.bf16 %v1937_v30, %v1933_v24 }
 0x111   : > { %v1941_v34 = vpop.eup %1940  ;;  %1960 = vpow2.f32 %v1643_v29  ;;  %v1766_v35 = vpop.f32.mrb[16].mxu0  ;;  %v806_v36 = vpack.c.bf16 %v1939_v32, %v1935_v28 }
 0x112   : > { %v1943_v37 = vpop.eup %1942  ;;  %v720_v38 = vadd.f32 1.0, %v1941_v34  ;;  %1962 = vpow2.f32 %v1641_v31  ;;  %v560_v39 = vadd.f32 %v1766_v35, %v2359_v26  ;;  %v551_v40 = vpop.f32.mrb[17].mxu0 }
 0x113   : > { %v1945_v41 = vpop.eup %1944  ;;  %v718_v42 = vadd.f32 1.0, %v1943_v37  ;;  %v552_v43 = vadd.f32 %v2359_v26, %v551_v40  ;;  %v1767_v44 = vpop.f32.mrb[18].mxu0  ;;  %1781 = vmatpush3.bf16.msra.mxu1 %v806_v36 }
 0x114   : > { %v1947_v45 = vpop.eup %1946  ;;  %1964 = vrcp.f32 %v720_v38  ;;  %v721_v46 = vadd.f32 1.0, %v1945_v41  ;;  %v1646_v47 = vmul.f32 -1.442695, %v560_v39  ;;  %v563_v48 = vadd.f32 %v1767_v44, %v2359_v26  ;;  %v554_v49 = vpop.f32.mrb[19].mxu0  ;;  %1782 = vmatprep.subr.bf16.mxu1 %v2204_v20 }
 0x115   : > { %v1949_v50 = vpop.eup %1948  ;;  %1966 = vrcp.f32 %v718_v42  ;;  %v719_v51 = vadd.f32 1.0, %v1947_v45  ;;  %v1644_v52 = vmul.f32 -1.442695, %v552_v43  ;;  %v555_v53 = vadd.f32 %v2359_v26, %v554_v49 }
 0x116   : > { %v1951_v54 = vpop.eup %1950  ;;  %1968 = vrcp.f32 %v721_v46  ;;  %v1647_v55 = vmul.f32 -1.442695, %v563_v48  ;;  %v1910_v48 = vld [vmem:[%s2561_s3 + $0x10] sm:$0xff]  }
 0x117   : > { %v1953_v57 = vpop.eup %1952  ;;  %1970 = vrcp.f32 %v719_v51  ;;  %v1645_v58 = vmul.f32 -1.442695, %v555_v53  ;;  %1783 = vmatpush3.bf16.msra.mxu1 %v807_v33 }
 0x118   : > { %v1955_v59 = vpop.eup %1954  ;;  %1972 = vpow2.f32 %v1646_v47  ;;  %1788 = vmatprep.subr.bf16.mxu1 %v2204_v20  ;;  %v809_v60 = vpack.c.bf16 %v1953_v57, %v1949_v50 }
 0x119   : > { %v1957_v61 = vpop.eup %1956  ;;  %1974 = vpow2.f32 %v1644_v52  ;;  %v1770_v62 = vpop.f32.mrb[20].mxu0  ;;  %v808_v63 = vpack.c.bf16 %v1955_v59, %v1951_v54 }
 0x11a   : > { %v1959_v0 = vpop.eup %1958  ;;  %v724_v1 = vadd.f32 1.0, %v1957_v61  ;;  %1976 = vpow2.f32 %v1647_v55  ;;  %v576_v2 = vadd.f32 %v1770_v62, %v2359_v26  ;;  %v567_v3 = vpop.f32.mrb[21].mxu0  ;;  %1785 = vmatmul.mubr.msk.bf16.vlgmr.msra.gmra.mrb[0].mxu1 %vm855_vm2, %v1908_v56 }
 0x11b   : > { %v1961_v4 = vpop.eup %1960  ;;  %v722_v5 = vadd.f32 1.0, %v1959_v0  ;;  %1978 = vpow2.f32 %v1645_v58  ;;  %v568_v6 = vadd.f32 %v2359_v26, %v567_v3  ;;  %v1771_v7 = vpop.f32.mrb[22].mxu0  ;;  %1789 = vmatpush3.bf16.msra.mxu1 %v808_v63  ;;  %1792 = vmatprep.mubr.msk.bf16.mxu1 %vm2205_vm1, %v2204_v20 }
 0x11c   : > { %v1963_v8 = vpop.eup %1962  ;;  %1980 = vrcp.f32 %v724_v1  ;;  %v725_v9 = vadd.f32 1.0, %v1961_v4  ;;  %v1650_v10 = vmul.f32 -1.442695, %v576_v2  ;;  %v579_v11 = vadd.f32 %v1771_v7, %v2359_v26  ;;  %v570_v12 = vpop.f32.mrb[23].mxu0  ;;  %1790 = vmatprep.subr.bf16.mxu1 %v2204_v20 }
 0x11d   : > { %1982 = vrcp.f32 %v722_v5  ;;  %v723_v13 = vadd.f32 1.0, %v1963_v8  ;;  %v1648_v14 = vmul.f32 -1.442695, %v568_v6  ;;  %v571_v15 = vadd.f32 %v2359_v26, %v570_v12 }
 0x11e   : > { %v1965_v16 = vpop.eup %1964  ;;  %1984 = vrcp.f32 %v725_v9  ;;  %v1651_v17 = vmul.f32 -1.442695, %v579_v11 }
 0x11f   : > { %v1967_v19 = vpop.eup %1966  ;;  %1986 = vrcp.f32 %v723_v13  ;;  %v1649_v21 = vmul.f32 -1.442695, %v571_v15  ;;  %1791 = vmatpush3.bf16.msra.mxu1 %v809_v60 }
 0x120   : > { %v1969_v22 = vpop.eup %1968  ;;  %1988 = vpow2.f32 %v1650_v10  ;;  %1796 = vmatprep.subr.bf16.mxu1 %v2204_v20  ;;  %v1911_v10 = vld [vmem:[%s2561_s3 + $0x18] sm:$0xff]  }
 0x121   : > { %v1971_v23 = vpop.eup %1970  ;;  %1990 = vpow2.f32 %v1648_v14  ;;  %v1774_v24 = vpop.f32.mrb[24].mxu0  ;;  %v811_v25 = vpack.c.bf16 %v1969_v22, %v1965_v16 }
 0x122   : > { %v1973_v27 = vpop.eup %1972  ;;  %1992 = vpow2.f32 %v1651_v17  ;;  %v592_v28 = vadd.f32 %v1774_v24, %v2359_v26  ;;  %v583_v29 = vpop.f32.mrb[25].mxu0  ;;  %1793 = vmatmul.mubr.msk.bf16.vlgmr.msra.gmra.mrb[4].mxu1 %vm855_vm2, %v1909_v18  ;;  %v810_v30 = vpack.c.bf16 %v1971_v23, %v1967_v19 }
 0x123   : > { %v1975_v31 = vpop.eup %1974  ;;  %v728_v32 = vadd.f32 1.0, %v1973_v27  ;;  %1994 = vpow2.f32 %v1649_v21  ;;  %v584_v33 = vadd.f32 %v2359_v26, %v583_v29  ;;  %v1775_v34 = vpop.f32.mrb[26].mxu0  ;;  %1800 = vmatprep.mubr.msk.bf16.mxu1 %vm2205_vm1, %v2204_v20 }
 0x124   : > { %v1977_v35 = vpop.eup %1976  ;;  %v726_v36 = vadd.f32 1.0, %v1975_v31  ;;  %v595_v37 = vadd.f32 %v1775_v34, %v2359_v26  ;;  %1797 = vmatpush3.bf16.msra.mxu1 %v810_v30  ;;  %v586_v38 = vpop.f32.mrb[27].mxu0  ;;  %v1654_v41 = vmul.f32 -1.442695, %v592_v28  ;;  %v1912_v28 = vld [vmem:[%s2561_s3 + $0x20] sm:$0xff]  }
 0x125   : > { %v1979_v39 = vpop.eup %1978  ;;  %1996 = vrcp.f32 %v728_v32  ;;  %v729_v40 = vadd.f32 1.0, %v1977_v35  ;;  %v587_v42 = vadd.f32 %v2359_v26, %v586_v38  ;;  %1798 = vmatprep.subr.bf16.mxu1 %v2204_v20  ;;  %v1652_v45 = vmul.f32 -1.442695, %v584_v33 }
 0x126   : > { %v1981_v43 = vpop.eup %1980  ;;  %1998 = vrcp.f32 %v726_v36  ;;  %v727_v44 = vadd.f32 1.0, %v1979_v39  ;;  %v1655_v47 = vmul.f32 -1.442695, %v595_v37 }
 0x127   : > { %v1983_v46 = vpop.eup %1982  ;;  %2000 = vrcp.f32 %v729_v40  ;;  %v1653_v50 = vmul.f32 -1.442695, %v587_v42  ;;  %v1913_v42 = vld [vmem:[%s2561_s3 + $0x28] sm:$0xff]  }
 0x128   : > { %v1985_v49 = vpop.eup %1984  ;;  %2002 = vrcp.f32 %v727_v44  ;;  %1799 = vmatpush3.bf16.msra.mxu1 %v811_v25 }
 0x129   : > { %v1987_v51 = vpop.eup %1986  ;;  %2004 = vpow2.f32 %v1654_v41  ;;  %v1778_v52 = vpop.f32.mrb[28].mxu0  ;;  %1804 = vmatprep.subr.bf16.mxu1 %v2204_v20  ;;  %v813_v53 = vpack.c.bf16 %v1985_v49, %v1981_v43 }
 0x12a   : > { %v1989_v54 = vpop.eup %1988  ;;  %2006 = vpow2.f32 %v1652_v45  ;;  %v608_v55 = vadd.f32 %v1778_v52, %v2359_v26  ;;  %v599_v56 = vpop.f32.mrb[29].mxu0  ;;  %v812_v57 = vpack.c.bf16 %v1987_v51, %v1983_v46 }
 0x12b   : > { %v1991_v58 = vpop.eup %1990  ;;  %v732_v59 = vadd.f32 1.0, %v1989_v54  ;;  %2008 = vpow2.f32 %v1655_v47  ;;  %v600_v60 = vadd.f32 %v2359_v26, %v599_v56  ;;  %1801 = vmatmul.mubr.msk.bf16.vlgmr.msra.gmra.mrb[8].mxu1 %vm855_vm2, %v1910_v48  ;;  %v1779_v61 = vpop.f32.mrb[30].mxu0 }
 0x12c   : > { %v1993_v62 = vpop.eup %1992  ;;  %v730_v63 = vadd.f32 1.0, %v1991_v58  ;;  %2010 = vpow2.f32 %v1653_v50  ;;  %v611_v0 = vadd.f32 %v1779_v61, %v2359_v26  ;;  %1805 = vmatpush3.bf16.msra.mxu1 %v812_v57  ;;  %v602_v1 = vpop.f32.mrb[31].mxu0  ;;  %1808 = vmatprep.mubr.msk.bf16.mxu1 %vm2205_vm1, %v2204_v20  ;;  %v1658_v4 = vmul.f32 -1.442695, %v608_v55  ;;  %v1914_v50 = vld [vmem:[%s2561_s3 + $0x30] sm:$0xff]   ;;  %v1915_v55 = vld [vmem:[%s2561_s3 + $0x38] sm:$0xff]  }
 0x12d   : > { %v1995_v2 = vpop.eup %1994  ;;  %2012 = vrcp.f32 %v732_v59  ;;  %v733_v3 = vadd.f32 1.0, %v1993_v62  ;;  %v603_v5 = vadd.f32 %v2359_v26, %v602_v1  ;;  %1806 = vmatprep.subr.bf16.mxu1 %v2204_v20  ;;  %v1656_v7 = vmul.f32 -1.442695, %v600_v60  ;;  %v2454_v56 = vpop.permute.xlu0 %842 }
 0x12e   : > { %2014 = vrcp.f32 %v730_v63  ;;  %v731_v6 = vadd.f32 1.0, %v1995_v2  ;;  %v1659_v9 = vmul.f32 -1.442695, %v611_v0  ;;  %v2460_v63 = vpop.permute.xlu1 %1263 }
 0x12f   : > { %v1997_v8 = vpop.eup %1996  ;;  %2016 = vrcp.f32 %v733_v3  ;;  %v1657_v12 = vmul.f32 -1.442695, %v603_v5 }
 0x130   : > { %v1999_v11 = vpop.eup %1998  ;;  %2018 = vrcp.f32 %v731_v6  ;;  %1807 = vmatpush3.bf16.msra.mxu1 %v813_v53 }
 0x131   : > { %v2001_v13 = vpop.eup %2000  ;;  %2020 = vpow2.f32 %v1658_v4  ;;  %1812 = vmatprep.subr.bf16.mxu1 %v2204_v20  ;;  %v2456_v58 = vpop.permute.xlu0 %847 }
 0x132   : > { %v2003_v26 = vpop.eup %2002  ;;  %2022 = vpow2.f32 %v1656_v7  ;;  %v815_v14 = vpack.c.bf16 %v2001_v13, %v1997_v8  ;;  %v2464_v7 = vpop.permute.xlu1 %1268 }
 0x133   : > { %v2005_v15 = vpop.eup %2004  ;;  %2024 = vpow2.f32 %v1659_v9  ;;  %1809 = vmatmul.mubr.msk.bf16.vlgmr.msra.gmra.mrb[12].mxu1 %vm855_vm2, %v1911_v10  ;;  %v814_v16 = vpack.c.bf16 %v2003_v26, %v1999_v11 }
 0x134   : > { %v2007_v17 = vpop.eup %2006  ;;  %v736_v18 = vadd.f32 1.0, %v2005_v15  ;;  %2026 = vpow2.f32 %v1657_v12  ;;  %1816 = vmatprep.mubr.msk.bf16.mxu1 %vm2205_vm1, %v2204_v20 }
 0x135   : > { %v2009_v19 = vpop.eup %2008  ;;  %v734_v21 = vadd.f32 1.0, %v2007_v17  ;;  %1813 = vmatpush3.bf16.msra.mxu1 %v814_v16 }
 0x136   : > { %v2011_v22 = vpop.eup %2010  ;;  %2028 = vrcp.f32 %v736_v18  ;;  %v737_v23 = vadd.f32 1.0, %v2009_v19  ;;  %1814 = vmatprep.subr.bf16.mxu1 %v2204_v20 }
 0x137   : > { %v2013_v24 = vpop.eup %2012  ;;  %2030 = vrcp.f32 %v734_v21  ;;  %v735_v25 = vadd.f32 1.0, %v2011_v22 }
 0x138   : > { %v2015_v27 = vpop.eup %2014  ;;  %2032 = vrcp.f32 %v737_v23 }
 0x139   : > { %v2017_v29 = vpop.eup %2016  ;;  %2034 = vrcp.f32 %v735_v25  ;;  %1815 = vmatpush3.bf16.msra.mxu1 %v815_v14 }
 0x13a   : > { %v2019_v30 = vpop.eup %2018  ;;  %1820 = vmatprep.subr.bf16.mxu1 %v2204_v20  ;;  %v817_v31 = vpack.c.bf16 %v2017_v29, %v2013_v24 }
 0x13b   : > { %v2021_v32 = vpop.eup %2020  ;;  %v816_v33 = vpack.c.bf16 %v2019_v30, %v2015_v27 }
 0x13c   : > { %v2023_v34 = vpop.eup %2022  ;;  %v740_v35 = vadd.f32 1.0, %v2021_v32  ;;  %1817 = vmatmul.mubr.msk.bf16.vlgmr.msra.gmra.mrb[16].mxu1 %vm855_vm2, %v1912_v28 }
 0x13d   : > { %v2025_v36 = vpop.eup %2024  ;;  %v738_v37 = vadd.f32 1.0, %v2023_v34  ;;  %1821 = vmatpush3.bf16.msra.mxu1 %v816_v33  ;;  %1824 = vmatprep.mubr.msk.bf16.mxu1 %vm2205_vm1, %v2204_v20 }
 0x13e   : > { %v2027_v38 = vpop.eup %2026  ;;  %2036 = vrcp.f32 %v740_v35  ;;  %v741_v39 = vadd.f32 1.0, %v2025_v36  ;;  %1822 = vmatprep.subr.bf16.mxu1 %v2204_v20 }
 0x13f   : > { %2038 = vrcp.f32 %v738_v37  ;;  %v739_v40 = vadd.f32 1.0, %v2027_v38 }
 0x140   : > { %v2029_v41 = vpop.eup %2028  ;;  %2040 = vrcp.f32 %v741_v39 }
 0x141   : > { %v2031_v43 = vpop.eup %2030  ;;  %2042 = vrcp.f32 %v739_v40  ;;  %1823 = vmatpush3.bf16.msra.mxu1 %v817_v31 }
 0x142   : > { %v2033_v44 = vpop.eup %2032  ;;  %1828 = vmatprep.subr.bf16.mxu1 %v2204_v20 }
 0x143   : > { %v2035_v45 = vpop.eup %2034  ;;  %v819_v46 = vpack.c.bf16 %v2033_v44, %v2029_v41 }
 0x144   : > { %1825 = vmatmul.mubr.msk.bf16.vlgmr.msra.gmra.mrb[20].mxu1 %vm855_vm2, %v1913_v42  ;;  %v818_v47 = vpack.c.bf16 %v2035_v45, %v2031_v43 }
 0x145   : > { %1832 = vmatprep.mubr.msk.bf16.mxu1 %vm2205_vm1, %v2204_v20 }
 0x146   : > { %1829 = vmatpush3.bf16.msra.mxu1 %v818_v47 }
 0x147   : > { %1830 = vmatprep.subr.bf16.mxu1 %v2204_v20 }
 0x148   : > { %v2037_v48 = vpop.eup %2036 }
 0x149   : > { %v2039_v49 = vpop.eup %2038 }
 0x14a   : > { %v2041_v51 = vpop.eup %2040  ;;  %1831 = vmatpush3.bf16.msra.mxu1 %v819_v46 }
 0x14b   : > { %v2043_v52 = vpop.eup %2042  ;;  %1836 = vmatprep.subr.bf16.mxu1 %v2204_v20  ;;  %v821_v53 = vpack.c.bf16 %v2041_v51, %v2037_v48 }
 0x14c   : > { %v820_v54 = vpack.c.bf16 %v2043_v52, %v2039_v49 }
 0x14d   : > { %1833 = vmatmul.mubr.msk.bf16.vlgmr.msra.gmra.mrb[24].mxu1 %vm855_vm2, %v1914_v50 }
 0x14e   : > { %1837 = vmatpush3.bf16.msra.mxu1 %v820_v54  ;;  %1840 = vmatprep.mubr.msk.bf16.mxu1 %vm2205_vm1, %v2204_v20 }
 0x14f   : > { %1838 = vmatprep.subr.bf16.mxu1 %v2204_v20 }
 0x152   : > { %1839 = vmatpush3.bf16.msra.mxu1 %v821_v53 }
 0x155   : > { %1841 = vmatmul.mubr.msk.bf16.vlgmr.msra.gmra.mrb[28].mxu1 %vm855_vm2, %v1915_v55 }
 0x1ed   : > { %v893_v57 = vpop.f32.mrb[0].mxu1 }
 0x1ee   : > { %v894_v59 = vadd.f32 %v893_v57, %v2454_v56  ;;  %v1786_v60 = vpop.f32.mrb[1].mxu1 }
 0x1ef   : > { %v896_v61 = vpop.f32.mrb[2].mxu1 }
 0x1f0   : > { %2044 = vtanh.f32 %v894_v59  ;;  %v897_v62 = vadd.f32 %v896_v61, %v2456_v58  ;;  %v1787_v20 = vpop.f32.mrb[3].mxu1 }
 0x1f2   : > { %2046 = vtanh.f32 %v897_v62 }
 0x1f5   : > { %v942_v0 = vpop.f32.mrb[4].mxu1 }
 0x1f6   : > { %v943_v1 = vadd.f32 %v942_v0, %v2454_v56  ;;  %v1794_v2 = vpop.f32.mrb[5].mxu1 }
 0x1f7   : > { %v945_v3 = vpop.f32.mrb[6].mxu1 }
 0x1f8   : > { %2048 = vtanh.f32 %v943_v1  ;;  %v946_v4 = vadd.f32 %v945_v3, %v2456_v58  ;;  %v1795_v5 = vpop.f32.mrb[7].mxu1 }
 0x1fa   : > { %v2045_v6 = vpop.eup %2044  ;;  %2050 = vtanh.f32 %v946_v4 }
 0x1fb   : > { %v1271_v8 = vmul.f32 %v2045_v6, %v2460_v63 }
 0x1fc   : > { %v2047_v9 = vpop.eup %2046 }
 0x1fd   : > { %v1272_v10 = vmul.f32 %v2047_v9, %v2464_v7  ;;  %v1287_v12 = vsel %vm404_vm0, %v1271_v8, 0.0 }
 0x1fe   : > { %v991_v11 = vpop.f32.mrb[8].mxu1 }
 0x1ff   : > { %v1288_v13 = vsel %vm404_vm0, %v1272_v10, 0.0  ;;  %v992_v26 = vadd.f32 %v991_v11, %v2454_v56  ;;  %v1802_v14 = vpop.f32.mrb[9].mxu1 }
 0x200   : > { %v1289_v15 = vadd.f32 %v1288_v13, %v1287_v12  ;;  %v994_v16 = vpop.f32.mrb[10].mxu1 }
 0x201   : > { %2052 = vtanh.f32 %v992_v26  ;;  %v995_v17 = vadd.f32 %v994_v16, %v2456_v58  ;;  %v1803_v18 = vpop.f32.mrb[11].mxu1 }
 0x202   : > { %v2049_v19 = vpop.eup %2048  ;;  %v1290_v21 = vrot.slane %v1289_v15, 4 }
 0x203   : > { %v1273_v22 = vmul.f32 %v2049_v19, %v2460_v63  ;;  %2054 = vtanh.f32 %v995_v17 }
 0x204   : > { %v2051_v23 = vpop.eup %2050  ;;  %v1291_v24 = vadd.f32 %v1290_v21, %v1289_v15 }
 0x205   : > { %v1274_v25 = vmul.f32 %v2051_v23, %v2464_v7  ;;  %v1296_v29 = vsel %vm404_vm0, %v1273_v22, 0.0 }
 0x206   : > { %v1292_v27 = vrot.slane %v1291_v24, 2  ;;  %v1040_v28 = vpop.f32.mrb[12].mxu1 }
 0x207   : > { %v1297_v30 = vsel %vm404_vm0, %v1274_v25, 0.0  ;;  %v1041_v31 = vadd.f32 %v1040_v28, %v2454_v56  ;;  %v1810_v32 = vpop.f32.mrb[13].mxu1 }
 0x208   : > { %v1293_v33 = vadd.f32 %v1292_v27, %v1291_v24  ;;  %v1298_v34 = vadd.f32 %v1297_v30, %v1296_v29  ;;  %v1043_v35 = vpop.f32.mrb[14].mxu1 }
 0x209   : > { %2056 = vtanh.f32 %v1041_v31  ;;  %v1044_v36 = vadd.f32 %v1043_v35, %v2456_v58  ;;  %v1811_v37 = vpop.f32.mrb[15].mxu1 }
 0x20a   : > { %v1294_v38 = vrot.slane %v1293_v33, 1  ;;  %v1299_v39 = vrot.slane %v1298_v34, 4 }
 0x20b   : > { %v2053_v40 = vpop.eup %2052  ;;  %2058 = vtanh.f32 %v1044_v36 }
 0x20c   : > { %v1295_v41 = vadd.f32 %v1294_v38, %v1293_v33  ;;  %v1300_v42 = vadd.f32 %v1299_v39, %v1298_v34  ;;  %v1275_v43 = vmul.f32 %v2053_v40, %v2460_v63 }
 0x20d   : > { %v2055_v44 = vpop.eup %2054 }
 0x20e   : > { %v1301_v45 = vrot.slane %v1300_v42, 2  ;;  %v1359_v46 = vadd.f32 -0.32041776, %v1295_v41  ;;  %v1276_v47 = vmul.f32 %v2055_v44, %v2464_v7  ;;  %v1305_v48 = vsel %vm404_vm0, %v1275_v43, 0.0 }
 0x20f   : > { %v1089_v49 = vpop.f32.mrb[16].mxu1 }
 0x210   : > { %v1302_v50 = vadd.f32 %v1301_v45, %v1300_v42  ;;  %v1676_v51 = vmul.f32 -1.442695, %v1359_v46  ;;  %v1306_v52 = vsel %vm404_vm0, %v1276_v47, 0.0  ;;  %v1090_v53 = vadd.f32 %v1089_v49, %v2454_v56  ;;  %v1818_v54 = vpop.f32.mrb[17].mxu1 }
 0x211   : > { %v1307_v55 = vadd.f32 %v1306_v52, %v1305_v48  ;;  %v1092_v57 = vpop.f32.mrb[18].mxu1 }
 0x212   : > { %v1303_v59 = vrot.slane %v1302_v50, 1  ;;  %2060 = vpow2.f32 %v1676_v51  ;;  %v1093_v60 = vadd.f32 %v1092_v57, %v2456_v58  ;;  %v1819_v61 = vpop.f32.mrb[19].mxu1 }
 0x213   : > { %v2057_v62 = vpop.eup %2056  ;;  %v1308_v20 = vrot.slane %v1307_v55, 4  ;;  %2062 = vtanh.f32 %v1090_v53 }
 0x214   : > { %v1304_v0 = vadd.f32 %v1303_v59, %v1302_v50  ;;  %v1277_v1 = vmul.f32 %v2057_v62, %v2460_v63  ;;  %2064 = vtanh.f32 %v1093_v60 }
 0x215   : > { %v2059_v2 = vpop.eup %2058  ;;  %v1309_v3 = vadd.f32 %v1308_v20, %v1307_v55 }
 0x216   : > { %v1360_v4 = vadd.f32 -0.32041776, %v1304_v0  ;;  %v1278_v5 = vmul.f32 %v2059_v2, %v2464_v7  ;;  %v1314_v10 = vsel %vm404_vm0, %v1277_v1, 0.0 }
 0x217   : > { %v1310_v6 = vrot.slane %v1309_v3, 2  ;;  %v1138_v8 = vpop.f32.mrb[20].mxu1 }
 0x218   : > { %v1677_v9 = vmul.f32 -1.442695, %v1360_v4  ;;  %v1315_v11 = vsel %vm404_vm0, %v1278_v5, 0.0  ;;  %v1139_v12 = vadd.f32 %v1138_v8, %v2454_v56  ;;  %v1826_v13 = vpop.f32.mrb[21].mxu1 }
 0x219   : > { %v1311_v26 = vadd.f32 %v1310_v6, %v1309_v3  ;;  %v1316_v14 = vadd.f32 %v1315_v11, %v1314_v10  ;;  %v1141_v15 = vpop.f32.mrb[22].mxu1 }
 0x21a   : > { %2066 = vpow2.f32 %v1677_v9  ;;  %v1142_v16 = vadd.f32 %v1141_v15, %v2456_v58  ;;  %v1827_v17 = vpop.f32.mrb[23].mxu1 }
 0x21b   : > { %v1312_v18 = vrot.slane %v1311_v26, 1  ;;  %v1317_v19 = vrot.slane %v1316_v14, 4  ;;  %2068 = vtanh.f32 %v1139_v12 }
 0x21c   : > { %v2061_v21 = vpop.eup %2060  ;;  %2070 = vtanh.f32 %v1142_v16 }
 0x21d   : > { %v2063_v22 = vpop.eup %2062  ;;  %v1391_v23 = vadd.f32 1.0, %v2061_v21  ;;  %v1313_v24 = vadd.f32 %v1312_v18, %v1311_v26  ;;  %v1318_v25 = vadd.f32 %v1317_v19, %v1316_v14 }
 0x21e   : > { %v2065_v27 = vpop.eup %2064  ;;  %v1279_v28 = vmul.f32 %v2063_v22, %v2460_v63 }
 0x21f   : > { %2072 = vrcp.f32 %v1391_v23  ;;  %v1361_v29 = vadd.f32 -0.32041776, %v1313_v24  ;;  %v1319_v30 = vrot.slane %v1318_v25, 2  ;;  %v1280_v31 = vmul.f32 %v2065_v27, %v2464_v7 }
 0x220   : > { %v1323_v32 = vsel %vm404_vm0, %v1279_v28, 0.0  ;;  %v1187_v33 = vpop.f32.mrb[24].mxu1 }
 0x221   : > { %v1678_v34 = vmul.f32 -1.442695, %v1361_v29  ;;  %v1320_v35 = vadd.f32 %v1319_v30, %v1318_v25  ;;  %v1324_v36 = vsel %vm404_vm0, %v1280_v31, 0.0  ;;  %v1188_v37 = vadd.f32 %v1187_v33, %v2454_v56  ;;  %v1834_v38 = vpop.f32.mrb[25].mxu1 }
 0x222   : > { %v1325_v39 = vadd.f32 %v1324_v36, %v1323_v32  ;;  %v1190_v40 = vpop.f32.mrb[26].mxu1 }
 0x223   : > { %2074 = vpow2.f32 %v1678_v34  ;;  %v1321_v41 = vrot.slane %v1320_v35, 1  ;;  %v1191_v42 = vadd.f32 %v1190_v40, %v2456_v58  ;;  %v1835_v43 = vpop.f32.mrb[27].mxu1 }
 0x224   : > { %v2067_v44 = vpop.eup %2066  ;;  %v1326_v45 = vrot.slane %v1325_v39, 4  ;;  %2076 = vtanh.f32 %v1188_v37 }
 0x225   : > { %v2069_v46 = vpop.eup %2068  ;;  %v1392_v47 = vadd.f32 1.0, %v2067_v44  ;;  %v1322_v48 = vadd.f32 %v1321_v41, %v1320_v35  ;;  %2078 = vtanh.f32 %v1191_v42 }
 0x226   : > { %v2071_v49 = vpop.eup %2070  ;;  %v1327_v50 = vadd.f32 %v1326_v45, %v1325_v39  ;;  %v1281_v51 = vmul.f32 %v2069_v46, %v2460_v63 }
 0x227   : > { %2080 = vrcp.f32 %v1392_v47  ;;  %v1362_v52 = vadd.f32 -0.32041776, %v1322_v48  ;;  %v1282_v53 = vmul.f32 %v2071_v49, %v2464_v7 }
 0x228   : > { %v1328_v54 = vrot.slane %v1327_v50, 2  ;;  %v1236_v55 = vpop.f32.mrb[28].mxu1  ;;  %v1332_v60 = vsel %vm404_vm0, %v1281_v51, 0.0 }
 0x229   : > { %v2073_v57 = vpop.eup %2072  ;;  %v1679_v59 = vmul.f32 -1.442695, %v1362_v52  ;;  %v1333_v61 = vsel %vm404_vm0, %v1282_v53, 0.0  ;;  %v1237_v62 = vadd.f32 %v1236_v55, %v2454_v56  ;;  %v1842_v20 = vpop.f32.mrb[29].mxu1 }
 0x22a   : > { %v1329_v0 = vadd.f32 %v1328_v54, %v1327_v50  ;;  %v1334_v1 = vadd.f32 %v1333_v61, %v1332_v60  ;;  %v1239_v2 = vpop.f32.mrb[30].mxu1  ;;  %v1415_v3 = vmul.f32 1.0011312, %v2073_v57 }
 0x22b   : > { %2082 = vpow2.f32 %v1679_v59  ;;  %v1240_v4 = vadd.f32 %v1239_v2, %v2456_v58  ;;  %v1843_v5 = vpop.f32.mrb[31].mxu1 }
 0x22c   : > { %v1330_v6 = vrot.slane %v1329_v0, 1  ;;  %v1335_v8 = vrot.slane %v1334_v1, 4  ;;  %2084 = vtanh.f32 %v1237_v62  ;;  %v1423_v9 = vadd.f32 0.009988688, %v1415_v3 }
 0x22d   : > { %v2075_v10 = vpop.eup %2074  ;;  %2086 = vtanh.f32 %v1240_v4 }
 0x22e   : > { %v2077_v11 = vpop.eup %2076  ;;  %v1393_v12 = vadd.f32 1.0, %v2075_v10  ;;  %v1331_v13 = vadd.f32 %v1330_v6, %v1329_v0  ;;  %v1336_v26 = vadd.f32 %v1335_v8, %v1334_v1  ;;  %v1684_v15 = vmul.f32 -1.442695, %v1423_v9 }
 0x22f   : > { %v2079_v56 = vpop.eup %2078  ;;  %v1283_v14 = vmul.f32 %v2077_v11, %v2460_v63 }
 0x230   : > { %2088 = vrcp.f32 %v1393_v12  ;;  %v1363_v16 = vadd.f32 -0.32041776, %v1331_v13  ;;  %v1337_v17 = vrot.slane %v1336_v26, 2  ;;  %v1284_v58 = vmul.f32 %v2079_v56, %v2464_v7 }
 0x231   : > { %v2081_v18 = vpop.eup %2080  ;;  %v1341_v19 = vsel %vm404_vm0, %v1283_v14, 0.0  ;;  %2090 = vpow2.f32 %v1684_v15 }
 0x232   : > { %v1680_v21 = vmul.f32 -1.442695, %v1363_v16  ;;  %v1338_v22 = vadd.f32 %v1337_v17, %v1336_v26  ;;  %v1342_v23 = vsel %vm404_vm0, %v1284_v58, 0.0  ;;  %v1416_v24 = vmul.f32 1.0011312, %v2081_v18 }
 0x233   : > { %v1343_v25 = vadd.f32 %v1342_v23, %v1341_v19 }
 0x234   : > { %2092 = vpow2.f32 %v1680_v21  ;;  %v1339_v27 = vrot.slane %v1338_v22, 1  ;;  %v1424_v28 = vadd.f32 0.009988688, %v1416_v24 }
 0x235   : > { %v2083_v29 = vpop.eup %2082  ;;  %v1344_v30 = vrot.slane %v1343_v25, 4 }
 0x236   : > { %v2085_v31 = vpop.eup %2084  ;;  %v1394_v32 = vadd.f32 1.0, %v2083_v29  ;;  %v1340_v33 = vadd.f32 %v1339_v27, %v1338_v22  ;;  %v1685_v34 = vmul.f32 -1.442695, %v1424_v28 }
 0x237   : > { %v2087_v35 = vpop.eup %2086  ;;  %v1345_v36 = vadd.f32 %v1344_v30, %v1343_v25  ;;  %v1285_v37 = vmul.f32 %v2085_v31, %v2460_v63 }
 0x238   : > { %2094 = vrcp.f32 %v1394_v32  ;;  %v1364_v38 = vadd.f32 -0.32041776, %v1340_v33  ;;  %v1286_v39 = vmul.f32 %v2087_v35, %v2464_v7 }
 0x239   : > { %v1346_v40 = vrot.slane %v1345_v36, 2  ;;  %2096 = vpow2.f32 %v1685_v34  ;;  %v1350_v43 = vsel %vm404_vm0, %v1285_v37, 0.0 }
 0x23a   : > { %v2089_v41 = vpop.eup %2088  ;;  %v1681_v42 = vmul.f32 -1.442695, %v1364_v38  ;;  %v1351_v44 = vsel %vm404_vm0, %v1286_v39, 0.0 }
 0x23b   : > { %v1417_v45 = vmul.f32 1.0011312, %v2089_v41  ;;  %v1347_v46 = vadd.f32 %v1346_v40, %v1345_v36  ;;  %v1352_v47 = vadd.f32 %v1351_v44, %v1350_v43  ;;  %v2091_v48 = vpop.eup %2090 }
 0x23c   : > { %2098 = vpow2.f32 %v1681_v42  ;;  %v1455_v55 = vadd.f32 1.0, %v2091_v48 }
 0x23d   : > { %v1348_v49 = vrot.slane %v1347_v46, 1  ;;  %v1353_v50 = vrot.slane %v1352_v47, 4  ;;  %v1425_v63 = vadd.f32 0.009988688, %v1417_v45 }
 0x23e   : > { %v2093_v51 = vpop.eup %2092 }
 0x23f   : > { %v1395_v52 = vadd.f32 1.0, %v2093_v51  ;;  %v1349_v53 = vadd.f32 %v1348_v49, %v1347_v46  ;;  %v1354_v7 = vadd.f32 %v1353_v50, %v1352_v47  ;;  %v1686_v54 = vmul.f32 -1.442695, %v1425_v63 }
 0x241   : > { %2100 = vrcp.f32 %v1395_v52  ;;  %v1365_v57 = vadd.f32 -0.32041776, %v1349_v53  ;;  %v1355_v59 = vrot.slane %v1354_v7, 2 }
 0x242   : > { %v2095_v60 = vpop.eup %2094  ;;  %2102 = vpow2.f32 %v1686_v54 }
 0x243   : > { %v2097_v61 = vpop.eup %2096  ;;  %v1682_v62 = vmul.f32 -1.442695, %v1365_v57  ;;  %v1356_v20 = vadd.f32 %v1355_v59, %v1354_v7  ;;  %v1418_v0 = vmul.f32 1.0011312, %v2095_v60  ;;  %2104 = vrcp.f32 %v1455_v55 }
 0x244   : > { %v1456_v1 = vadd.f32 1.0, %v2097_v61 }
 0x245   : > { %2106 = vpow2.f32 %v1682_v62  ;;  %v1357_v2 = vrot.slane %v1356_v20, 1  ;;  %v1426_v3 = vadd.f32 0.009988688, %v1418_v0 }
 0x246   : > { %v2099_v4 = vpop.eup %2098  ;;  %2108 = vrcp.f32 %v1456_v1 }
 0x247   : > { %v1396_v5 = vadd.f32 1.0, %v2099_v4  ;;  %v1358_v6 = vadd.f32 %v1357_v2, %v1356_v20  ;;  %v1687_v8 = vmul.f32 -1.442695, %v1426_v3 }
 0x249   : > { %v1366_v9 = vadd.f32 -0.32041776, %v1358_v6  ;;  %2110 = vrcp.f32 %v1396_v5 }
 0x24a   : > { %2112 = vpow2.f32 %v1687_v8 }
 0x24b   : > { %v2101_v10 = vpop.eup %2100  ;;  %v1683_v11 = vmul.f32 -1.442695, %v1366_v9 }
 0x24c   : > { %v2103_v12 = vpop.eup %2102  ;;  %v1419_v13 = vmul.f32 1.0011312, %v2101_v10 }
 0x24d   : > { %2114 = vpow2.f32 %v1683_v11  ;;  %v1457_v26 = vadd.f32 1.0, %v2103_v12  ;;  %v2105_v56 = vpop.eup %2104 }
 0x24e   : > { %v1427_v14 = vadd.f32 0.009988688, %v1419_v13  ;;  %v1479_v18 = vmul.f32 255.0, %v2105_v56 }
 0x24f   : > { %v2107_v15 = vpop.eup %2106  ;;  %2116 = vrcp.f32 %v1457_v26 }
 0x250   : > { %v2109_v16 = vpop.eup %2108  ;;  %v1397_v17 = vadd.f32 1.0, %v2107_v15  ;;  %v1688_v58 = vmul.f32 -1.442695, %v1427_v14 }
 0x251   : > { %v1480_v19 = vmul.f32 255.0, %v2109_v16 }
 0x252   : > { %2118 = vrcp.f32 %v1397_v17 }
 0x253   : > { %v2111_v21 = vpop.eup %2110  ;;  %2120 = vpow2.f32 %v1688_v58  ;;  %v1496_v22 = vsel %vm1495_vm3, %v1480_v19, %v1479_v18 }
 0x254   : > { %v2113_v23 = vpop.eup %2112  ;;  %v1420_v24 = vmul.f32 1.0011312, %v2111_v21 }
 0x255   : > { %v1458_v25 = vadd.f32 1.0, %v2113_v23 }
 0x256   : > { %v1428_v27 = vadd.f32 0.009988688, %v1420_v24 }
 0x257   : > { %v2115_v28 = vpop.eup %2114  ;;  %2122 = vrcp.f32 %v1458_v25 }
 0x258   : > { %v1398_v29 = vadd.f32 1.0, %v2115_v28  ;;  %v1689_v30 = vmul.f32 -1.442695, %v1428_v27 }
 0x259   : > { %v2117_v31 = vpop.eup %2116 }
 0x25a   : > { %2124 = vrcp.f32 %v1398_v29  ;;  %v1481_v32 = vmul.f32 255.0, %v2117_v31 }
 0x25b   : > { %2126 = vpow2.f32 %v1689_v30 }
 0x25c   : > { %v2119_v33 = vpop.eup %2118  ;;  %v1498_v34 = vsel %vm1497_vm4, %v1481_v32, %v1496_v22 }
 0x25d   : > { %v2121_v35 = vpop.eup %2120  ;;  %v1421_v36 = vmul.f32 1.0011312, %v2119_v33 }
 0x25e   : > { %v1459_v37 = vadd.f32 1.0, %v2121_v35 }
 0x25f   : > { %v1429_v38 = vadd.f32 0.009988688, %v1421_v36 }
 0x260   : > { %2128 = vrcp.f32 %v1459_v37 }
 0x261   : > { %v2123_v39 = vpop.eup %2122  ;;  %v1690_v40 = vmul.f32 -1.442695, %v1429_v38 }
 0x262   : > { %v1482_v41 = vmul.f32 255.0, %v2123_v39 }
 0x263   : > { %2130 = vpow2.f32 %v1690_v40 }
 0x264   : > { %v2125_v42 = vpop.eup %2124  ;;  %v1500_v43 = vsel %vm1499_vm5, %v1482_v41, %v1498_v34 }
 0x265   : > { %v2127_v44 = vpop.eup %2126  ;;  %v1422_v45 = vmul.f32 1.0011312, %v2125_v42 }
 0x266   : > { %v1460_v46 = vadd.f32 1.0, %v2127_v44 }
 0x267   : > { %v1430_v47 = vadd.f32 0.009988688, %v1422_v45 }
 0x268   : > { %2132 = vrcp.f32 %v1460_v46 }
 0x269   : > { %v1691_v48 = vmul.f32 -1.442695, %v1430_v47 }
 0x26a   : > { %v2129_v49 = vpop.eup %2128 }
 0x26b   : > { %2134 = vpow2.f32 %v1691_v48  ;;  %v1483_v50 = vmul.f32 255.0, %v2129_v49 }
 0x26d   : > { %v2131_v63 = vpop.eup %2130  ;;  %v1502_v51 = vsel %vm1501_vm6, %v1483_v50, %v1500_v43 }
 0x26e   : > { %v1461_v52 = vadd.f32 1.0, %v2131_v63 }
 0x270   : > { %2136 = vrcp.f32 %v1461_v52 }
 0x272   : > { %v2133_v53 = vpop.eup %2132 }
 0x273   : > { %v1484_v7 = vmul.f32 255.0, %v2133_v53 }
 0x275   : > { %v2135_v54 = vpop.eup %2134  ;;  %v1504_v55 = vsel %vm1503_vm7, %v1484_v7, %v1502_v51 }
 0x276   : > { %v1462_v57 = vadd.f32 1.0, %v2135_v54 }
 0x278   : > { %2138 = vrcp.f32 %v1462_v57 }
 0x27a   : > { %v2137_v59 = vpop.eup %2136 }
 0x27b   : > { %v1485_v60 = vmul.f32 255.0, %v2137_v59 }
 0x27d   : > { %v1506_v61 = vsel %vm1505_vm8, %v1485_v60, %v1504_v55 }
 0x282   : > { %v2139_v62 = vpop.eup %2138 }
 0x283   : > { %v1486_v20 = vmul.f32 255.0, %v2139_v62 }
 0x285   : > { %v1508_v0 = vsel %vm1507_vm9, %v1486_v20, %v1506_v61 }
 0x286   : > { %1510 = vst.msk [vmem:[%s245_s26] sm:$0xff] %vm404_vm0, %v1508_v0 }
 0x287   : > { %2153 = shalt.err (!%p2150_p3)
}
 0x288   : > { %s2154_s15 = scalar_lea.hbm %s2515_s10, 128  ;;  %s2158_s18 = scalar_lea.hbm %s2564_s6, 256 }
 0x289   : > { %p2155_p4 = scmp.ne.s32.totalorder %s2515_s10, %s2154_s15  ;;  %p2159_p9 = scmp.lt.u32.totalorder %s2515_s10, %s2564_s6 }
 0x28a   : > { %p2160_p10 = scmp.lt.u32.totalorder %s2158_s18, %s2154_s15  ;;  %p2162_p12 = scmp.lt.u32.totalorder %s2154_s15, %s2515_s10 }
 0x28b   : > { %p2156_p7 = pnand %p2155_p4, %p2281_p5 }
 0x28c   : > { %p2161_p11 = por %p2160_p10, %p2159_p9 }
 0x28d   : > { %p2157_p8 = pneg %p2156_p7 }
 0x28e   : > { %p2163_p13 = por %p2162_p12, %p2161_p11 }
 0x290   : > { %p2164_p0 = pnand %p2163_p13, %p2157_p8 }
 0x292   : > { %2167 = shalt.err (!%p2164_p0)
}
 0x293   : > { %1844 = dma.vmem_to_hbm [thread:$0]  (%p2281_p5), %s2517_s28, 128, %s2515_s10, %s1512_s11  }
 0x294 PF: > { %p1850_p1 = scmp.ge.s32.totalorder %s2202_s24, 2  ;;  %s1537_s26 = sand.u32 1, %s2190_s21  }
 0x295   : > { %s1538_s29 = scalar_lea.sflag [#allocation3], %s1537_s26 }
 0x296   : > { %p1847_p2 = pnand %p1850_p1, %p2285_p6 }
 0x298   : > { %2185 = dma.done.wait (!%p1847_p2), %s1538_s29, 128  }
 0x299   : > { %2187 = vsyncadd (!%p1847_p2), %s1538_s29, 4294967168  ;;  %p16_p3 = scmp.ge.s32.totalorder %s2268_s27, 4   ;;  %s2567_s21 = smov %s2194_s22 }
 0x29a   : > { %s2568_s22 = smov %s2198_s23  ;;  %s2569_s23 = smov %s2279_s30 }
 0x29b   : > { %s2570_s24 = smov %s2268_s27  ;;  %18 = sbr.rel (!%p16_p3) target bundleno = 3 (0x3), region = 79 }
 0x2a2   :  { %1543 = vsyncpa [#allocation3], 1 }
 0x2a3   :  { %1545 = vsyncpa [#allocation3 + $0x1], 1 }

</bundles_post_ra>
